<compile_context>
chip_gen: v5e
topology: v5e:2x2
jax: 0.10.0
libtpu: 0.0.40
codegen_flags: <defaults>
</compile_context>

<pallas_src>
import functools

import jax
import jax.numpy as jnp
from jax import lax
from jax.experimental import pallas as pl
from jax.experimental.pallas import tpu as pltpu


def attention_block_kernel(x_ref, ca_ref, cb2_ref, p1_ref, p2_ref, bp_ref,
                           out_ref, *, W, C, C4, C_pad):
    Bt, _, HW = x_ref.shape
    x = x_ref[...]                                            # (Bt, C, HW)

    # ---------------- Channel attention (batch-vectorized, VPU/XLU) ----------
    g = jnp.sum(x, axis=2, keepdims=True) * (1.0 / HW)        # (Bt, C, 1)
    cw1t = ca_ref[0:C, :]                                     # (C_in, C_out)
    cb1 = ca_ref[C_pad:C_pad + 1, :]                          # (1, C_out)
    cw2 = ca_ref[2 * C_pad:2 * C_pad + C, :]                  # (C_out, C_in)
    a = jnp.sum(cw1t[None] * g, axis=1, keepdims=True) + cb1  # (Bt, 1, C)
    a = jnp.maximum(a, 0.0)
    ca = jnp.sum(cw2[None] * a, axis=2, keepdims=True) + cb2_ref[...]  # (Bt, C, 1)
    ca = jax.nn.sigmoid(ca)
    y = x * ca                                                # (Bt, C, HW)

    # ---------------- Pixel attention ----------------
    CENTER = 4
    shifts = []
    for t in range(9):
        ky, kx = divmod(t, 3)
        shifts.append((-((ky - 1) * W + (kx - 1))) % HW)      # static lane shifts

    # conv1: 3x3, C -> C4.  Rolls on the flat (Bt*C, HW) view (2-D lane
    # rotation; layout-preserving reshape since C is a sublane multiple);
    # masked weight planes broadcast over the leading batch dim.
    yf = y.reshape(Bt * C, HW)
    acc1 = [y * p1_ref[CENTER * C4 + o] for o in range(C4)]   # center-tap init
    for t in range(9):
        if t == CENTER:
            continue
        wnd = pltpu.roll(yf, shifts[t], axis=1).reshape(Bt, C, HW)
        for o in range(C4):
            acc1[o] = acc1[o] + wnd * p1_ref[t * C4 + o]
    a1 = [jnp.maximum(jnp.sum(acc1[o], axis=1, keepdims=True)
                      + bp_ref[o:o + 1, :], 0.0)
          for o in range(C4)]                                 # C4 x (Bt, 1, HW)

    # conv2: 3x3, C4 -> 1, then sigmoid gate.  Tiny; per-image 2-D rolls so
    # all rotations stay rank-2 (loop-free at the default batch_block=1).
    pb2 = bp_ref[C4:C4 + 1, :]                                # (1, HW)
    for b in range(Bt):
        a1_b = jnp.concatenate([a1[o][b] for o in range(C4)], axis=0)  # (C4, HW)
        acc2 = a1_b * p2_ref[CENTER]                          # center-tap init
        for t in range(9):
            if t == CENTER:
                continue
            acc2 = acc2 + pltpu.roll(a1_b, shifts[t], axis=1) * p2_ref[t]
        patt = jax.nn.sigmoid(jnp.sum(acc2, axis=0, keepdims=True) + pb2)  # (1, HW)
        out_ref[b] = y[b] * patt                              # (C, HW), lane-dense


def attention_block(x_nchw, kparams, *, batch_block=1):
    """x_nchw: (B, C, H, W) float32 (PyTorch layout)."""
    B, C, H, W = x_nchw.shape
    HW = H * W
    C4 = kparams["plane2"].shape[1]
    C_pad = kparams["ca_pack"].shape[0] // 3
    assert B % batch_block == 0
    x2 = x_nchw.reshape(B, C, HW)                             # lane-dense last dim

    def const_spec(arr):
        nd = arr.ndim
        return pl.BlockSpec(arr.shape, lambda b, _nd=nd: (0,) * _nd)

    out2 = pl.pallas_call(
        functools.partial(attention_block_kernel, W=W, C=C, C4=C4, C_pad=C_pad),
        out_shape=jax.ShapeDtypeStruct((B, C, HW), jnp.float32),
        grid_spec=pltpu.PrefetchScalarGridSpec(
            num_scalar_prefetch=0,
            grid=(B // batch_block,),
            in_specs=[
                pl.BlockSpec((batch_block, C, HW), lambda b: (b, 0, 0)),  # x
                const_spec(kparams["ca_pack"]),
                const_spec(kparams["cb2_col"]),
                const_spec(kparams["plane1"]),
                const_spec(kparams["plane2"]),
                const_spec(kparams["bias_planes"]),
            ],
            out_specs=pl.BlockSpec((batch_block, C, HW), lambda b: (b, 0, 0)),
        ),
        compiler_params=pltpu.CompilerParams(
            dimension_semantics=("parallel",)),
    )(x2, kparams["ca_pack"], kparams["cb2_col"], kparams["plane1"],
      kparams["plane2"], kparams["bias_planes"])
    return out2.reshape(B, C, H, W)


def init_params(key, C):
    """Raw parameters in PyTorch layouts (conv weights OIHW; 1x1 squeezed to (out,in))."""
    C4 = C // 4
    ks = jax.random.split(key, 8)
    s = 0.1
    return {
        "ca_w1": s * jax.random.normal(ks[0], (C, C), jnp.float32),
        "ca_b1": s * jax.random.normal(ks[1], (C,), jnp.float32),
        "ca_w2": s * jax.random.normal(ks[2], (C, C), jnp.float32),
        "ca_b2": s * jax.random.normal(ks[3], (C,), jnp.float32),
        "pa_w1": s * jax.random.normal(ks[4], (C4, C, 3, 3), jnp.float32),
        "pa_b1": s * jax.random.normal(ks[5], (C4,), jnp.float32),
        "pa_w2": s * jax.random.normal(ks[6], (1, C4, 3, 3), jnp.float32),
        "pa_b2": s * jax.random.normal(ks[7], (1,), jnp.float32),
    }


def prepare_kernel_params(raw, H, W):
    """Fold masks into per-tap weight planes and pack the tiny params."""
    C = raw["ca_w1"].shape[0]
    C4 = raw["pa_w1"].shape[0]
    HW = H * W
    C_pad = ((C + 7) // 8) * 8

    # Border-validity masks for the 9 taps of a zero-padded SAME 3x3 conv,
    # indexed by output pixel, flattened row-major over (H, W).
    h = jnp.arange(H)[:, None]
    w = jnp.arange(W)[None, :]
    masks = []
    for ky in range(3):
        for kx in range(3):
            dy, dx = ky - 1, kx - 1
            valid = ((h + dy >= 0) & (h + dy <= H - 1) &
                     (w + dx >= 0) & (w + dx <= W - 1))
            masks.append(valid.reshape(HW))
    tap_masks = jnp.stack(masks, axis=0).astype(jnp.float32)            # (9, HW)

    # Masked weight planes (mask folded into the conv weights).
    w1 = jnp.transpose(raw["pa_w1"], (2, 3, 0, 1)).reshape(9, C4, C)     # [t, o, c]
    plane1 = (w1[:, :, :, None] * tap_masks[:, None, None, :]
              ).reshape(9 * C4, C, HW)                                   # [t*C4+o, c, hw]
    w2 = jnp.transpose(raw["pa_w2"], (2, 3, 0, 1)).reshape(9, C4)        # [t, o]
    plane2 = w2[:, :, None] * tap_masks[:, None, :]                      # (9, C4, HW)

    # Channel-attention pack (8-row aligned sections):
    #   rows [0, C)              : W1^T  (in-channel sublane, out-channel lane)
    #   row  C_pad               : b1    (out-channel lane)
    #   rows [2*C_pad, 2*C_pad+C): W2    (out-channel sublane, in-channel lane)
    ca_pack = jnp.zeros((3 * C_pad, C), jnp.float32)
    ca_pack = ca_pack.at[0:C, :].set(raw["ca_w1"].T)
    ca_pack = ca_pack.at[C_pad, :].set(raw["ca_b1"])
    ca_pack = ca_pack.at[2 * C_pad:2 * C_pad + C, :].set(raw["ca_w2"])

    # Lane-replicated bias planes for the pixel-attention convs (lane-aligned adds).
    bias_planes = jnp.concatenate(
        [jnp.broadcast_to(raw["pa_b1"][:, None], (C4, HW)),
         jnp.broadcast_to(raw["pa_b2"][:, None], (1, HW))], axis=0)      # (C4+1, HW)

    return {
        "ca_pack": ca_pack,
        "cb2_col": raw["ca_b2"].reshape(C, 1),
        "plane1": plane1,
        "plane2": plane2,
        "bias_planes": bias_planes,
    }


def reference(x, raw):
    """Plain-JAX (NCHW) reference of the PyTorch forward."""
    hp = lax.Precision.HIGHEST
    g = jnp.mean(x, axis=(2, 3), keepdims=True)                          # (B,C,1,1)
    a = jnp.einsum("bcij,oc->boij", g, raw["ca_w1"], precision=hp)
    a = jax.nn.relu(a + raw["ca_b1"].reshape(1, -1, 1, 1))
    ca = jnp.einsum("bcij,oc->boij", a, raw["ca_w2"], precision=hp)
    ca = jax.nn.sigmoid(ca + raw["ca_b2"].reshape(1, -1, 1, 1))
    y = x * ca
    a1 = lax.conv_general_dilated(y, raw["pa_w1"], (1, 1), "SAME",
                                  dimension_numbers=("NCHW", "OIHW", "NCHW"),
                                  precision=hp)
    a1 = jax.nn.relu(a1 + raw["pa_b1"].reshape(1, -1, 1, 1))
    a2 = lax.conv_general_dilated(a1, raw["pa_w2"], (1, 1), "SAME",
                                  dimension_numbers=("NCHW", "OIHW", "NCHW"),
                                  precision=hp)
    patt = jax.nn.sigmoid(a2 + raw["pa_b2"].reshape(1, 1, 1, 1))
    return y * patt


if __name__ == "__main__":
    key = jax.random.PRNGKey(0)
    B, C, H, W = 2, 8, 16, 16        # C % 4 == 0 (C//4 = 2); H*W = 256 lanes (dense)

    kx, kp = jax.random.split(key)
    x = jax.random.normal(kx, (B, C, H, W), jnp.float32)     # PyTorch-style NCHW input

    raw = init_params(kp, C)
    kparams = prepare_kernel_params(raw, H, W)

    # batch_block=1 keeps 2 parallel grid steps for B=2 (both v7x TCs busy);
    # raise it (<= ~4) on single-TC v5e/v6e to amortize per-step overhead.
    run = jax.jit(functools.partial(attention_block, batch_block=1))
    out = jax.block_until_ready(run(x, kparams))

    ref = reference(x, raw)
    assert out.shape == (B, C, H, W)
    err = jnp.max(jnp.abs(out - ref))
    assert jnp.allclose(out, ref, atol=2e-4, rtol=2e-4), f"max abs err = {err}"

    print("KERNEL_OK")
</pallas_src>

<mosaic_0001>
module attributes {stable_mosaic.version = 11 : i64} {
  func.func @attention_block_kernel(%arg0: i32, %arg1: memref<1x8x256xf32, #tpu.memory_space<vmem>>, %arg2: memref<24x8xf32, #tpu.memory_space<vmem>>, %arg3: memref<8x1xf32, #tpu.memory_space<vmem>>, %arg4: memref<18x8x256xf32, #tpu.memory_space<vmem>>, %arg5: memref<9x2x256xf32, #tpu.memory_space<vmem>>, %arg6: memref<3x256xf32, #tpu.memory_space<vmem>>, %arg7: memref<1x8x256xf32, #tpu.memory_space<vmem>>) attributes {dimension_semantics = [#tpu.dimension_semantics<parallel>], iteration_bounds = array<i64: 2>, scalar_prefetch = 0 : i64, scratch_operands = 0 : i64, tpu.core_type = #tpu.core_type<tc>, window_params = [{transform_indices = @transform_0, window_bounds = array<i64: 1, 8, 256>}, {pipeline_mode = #tpu.pipeline_mode<synchronous>, transform_indices = @transform_1, window_bounds = array<i64: 24, 8>}, {pipeline_mode = #tpu.pipeline_mode<synchronous>, transform_indices = @transform_2, window_bounds = array<i64: 8, 1>}, {pipeline_mode = #tpu.pipeline_mode<synchronous>, transform_indices = @transform_3, window_bounds = array<i64: 18, 8, 256>}, {pipeline_mode = #tpu.pipeline_mode<synchronous>, transform_indices = @transform_4, window_bounds = array<i64: 9, 2, 256>}, {pipeline_mode = #tpu.pipeline_mode<synchronous>, transform_indices = @transform_5, window_bounds = array<i64: 3, 256>}, {transform_indices = @transform_6, window_bounds = array<i64: 1, 8, 256>}]} {
    %c0 = arith.constant 0 : index
    %c0_0 = arith.constant 0 : index
    %c0_1 = arith.constant 0 : index
    %0 = vector.load %arg1[%c0, %c0_0, %c0_1] : memref<1x8x256xf32, #tpu.memory_space<vmem>>, vector<1x8x256xf32>
    %cst = arith.constant dense<0.000000e+00> : vector<1x8xf32>
    %1 = vector.multi_reduction <add>, %0, %cst [2] : vector<1x8x256xf32> to vector<1x8xf32>
    %2 = vector.shape_cast %1 : vector<1x8xf32> to vector<1x8x1xf32>
    %cst_2 = arith.constant 3.906250e-03 : f32
    %3 = vector.broadcast %cst_2 : f32 to vector<1x8x1xf32>
    %4 = arith.mulf %2, %3 : vector<1x8x1xf32>
    %c0_3 = arith.constant 0 : index
    %c0_4 = arith.constant 0 : index
    %5 = vector.load %arg2[%c0_3, %c0_4] : memref<24x8xf32, #tpu.memory_space<vmem>>, vector<8x8xf32>
    %c8 = arith.constant 8 : index
    %c0_5 = arith.constant 0 : index
    %6 = vector.load %arg2[%c8, %c0_5] : memref<24x8xf32, #tpu.memory_space<vmem>>, vector<1x8xf32>
    %c16 = arith.constant 16 : index
    %c0_6 = arith.constant 0 : index
    %7 = vector.load %arg2[%c16, %c0_6] : memref<24x8xf32, #tpu.memory_space<vmem>>, vector<8x8xf32>
    %8 = vector.shape_cast %5 : vector<8x8xf32> to vector<1x8x8xf32>
    %9 = vector.broadcast %4 : vector<1x8x1xf32> to vector<1x8x8xf32>
    %10 = arith.mulf %8, %9 : vector<1x8x8xf32>
    %cst_7 = arith.constant dense<0.000000e+00> : vector<1x8xf32>
    %11 = vector.multi_reduction <add>, %10, %cst_7 [1] : vector<1x8x8xf32> to vector<1x8xf32>
    %12 = vector.shape_cast %11 : vector<1x8xf32> to vector<1x1x8xf32>
    %13 = vector.shape_cast %6 : vector<1x8xf32> to vector<1x1x8xf32>
    %14 = arith.addf %12, %13 : vector<1x1x8xf32>
    %cst_8 = arith.constant 0.000000e+00 : f32
    %15 = vector.broadcast %cst_8 : f32 to vector<1x1x8xf32>
    %16 = arith.maximumf %14, %15 : vector<1x1x8xf32>
    %17 = vector.shape_cast %7 : vector<8x8xf32> to vector<1x8x8xf32>
    %18 = vector.broadcast %16 : vector<1x1x8xf32> to vector<1x8x8xf32>
    %19 = arith.mulf %17, %18 : vector<1x8x8xf32>
    %cst_9 = arith.constant dense<0.000000e+00> : vector<1x8xf32>
    %20 = vector.multi_reduction <add>, %19, %cst_9 [2] : vector<1x8x8xf32> to vector<1x8xf32>
    %21 = vector.shape_cast %20 : vector<1x8xf32> to vector<1x8x1xf32>
    %c0_10 = arith.constant 0 : index
    %c0_11 = arith.constant 0 : index
    %22 = vector.load %arg3[%c0_10, %c0_11] : memref<8x1xf32, #tpu.memory_space<vmem>>, vector<8x1xf32>
    %23 = vector.shape_cast %22 : vector<8x1xf32> to vector<1x8x1xf32>
    %24 = arith.addf %21, %23 : vector<1x8x1xf32>
    %25 = arith.negf %24 : vector<1x8x1xf32>
    %26 = math.exp %25 : vector<1x8x1xf32>
    %cst_12 = arith.constant 1.000000e+00 : f32
    %27 = vector.broadcast %cst_12 : f32 to vector<1x8x1xf32>
    %28 = arith.addf %27, %26 : vector<1x8x1xf32>
    %29 = arith.divf %27, %28 : vector<1x8x1xf32>
    %30 = vector.broadcast %29 : vector<1x8x1xf32> to vector<1x8x256xf32>
    %31 = arith.mulf %0, %30 : vector<1x8x256xf32>
    %32 = vector.shape_cast %31 : vector<1x8x256xf32> to vector<8x256xf32>
    %c8_13 = arith.constant 8 : index
    %c0_14 = arith.constant 0 : index
    %c0_15 = arith.constant 0 : index
    %33 = vector.load %arg4[%c8_13, %c0_14, %c0_15] : memref<18x8x256xf32, #tpu.memory_space<vmem>>, vector<1x8x256xf32>
    %34 = vector.shape_cast %33 : vector<1x8x256xf32> to vector<8x256xf32>
    %35 = vector.shape_cast %34 : vector<8x256xf32> to vector<1x8x256xf32>
    %36 = arith.mulf %31, %35 : vector<1x8x256xf32>
    %c9 = arith.constant 9 : index
    %c0_16 = arith.constant 0 : index
    %c0_17 = arith.constant 0 : index
    %37 = vector.load %arg4[%c9, %c0_16, %c0_17] : memref<18x8x256xf32, #tpu.memory_space<vmem>>, vector<1x8x256xf32>
    %38 = vector.shape_cast %37 : vector<1x8x256xf32> to vector<8x256xf32>
    %39 = vector.shape_cast %38 : vector<8x256xf32> to vector<1x8x256xf32>
    %40 = arith.mulf %31, %39 : vector<1x8x256xf32>
    %c17_i32 = arith.constant 17 : i32
    %41 = tpu.dynamic_rotate %32 by %c17_i32 dim 1 : vector<8x256xf32>, i32 -> vector<8x256xf32>
    %42 = vector.shape_cast %41 : vector<8x256xf32> to vector<1x8x256xf32>
    %c0_18 = arith.constant 0 : index
    %c0_19 = arith.constant 0 : index
    %c0_20 = arith.constant 0 : index
    %43 = vector.load %arg4[%c0_18, %c0_19, %c0_20] : memref<18x8x256xf32, #tpu.memory_space<vmem>>, vector<1x8x256xf32>
    %44 = vector.shape_cast %43 : vector<1x8x256xf32> to vector<8x256xf32>
    %45 = vector.shape_cast %44 : vector<8x256xf32> to vector<1x8x256xf32>
    %46 = arith.mulf %42, %45 : vector<1x8x256xf32>
    %47 = arith.addf %36, %46 : vector<1x8x256xf32>
    %c1 = arith.constant 1 : index
    %c0_21 = arith.constant 0 : index
    %c0_22 = arith.constant 0 : index
    %48 = vector.load %arg4[%c1, %c0_21, %c0_22] : memref<18x8x256xf32, #tpu.memory_space<vmem>>, vector<1x8x256xf32>
    %49 = vector.shape_cast %48 : vector<1x8x256xf32> to vector<8x256xf32>
    %50 = vector.shape_cast %49 : vector<8x256xf32> to vector<1x8x256xf32>
    %51 = arith.mulf %42, %50 : vector<1x8x256xf32>
    %52 = arith.addf %40, %51 : vector<1x8x256xf32>
    %c16_i32 = arith.constant 16 : i32
    %53 = tpu.dynamic_rotate %32 by %c16_i32 dim 1 : vector<8x256xf32>, i32 -> vector<8x256xf32>
    %54 = vector.shape_cast %53 : vector<8x256xf32> to vector<1x8x256xf32>
    %c2 = arith.constant 2 : index
    %c0_23 = arith.constant 0 : index
    %c0_24 = arith.constant 0 : index
    %55 = vector.load %arg4[%c2, %c0_23, %c0_24] : memref<18x8x256xf32, #tpu.memory_space<vmem>>, vector<1x8x256xf32>
    %56 = vector.shape_cast %55 : vector<1x8x256xf32> to vector<8x256xf32>
    %57 = vector.shape_cast %56 : vector<8x256xf32> to vector<1x8x256xf32>
    %58 = arith.mulf %54, %57 : vector<1x8x256xf32>
    %59 = arith.addf %47, %58 : vector<1x8x256xf32>
    %c3 = arith.constant 3 : index
    %c0_25 = arith.constant 0 : index
    %c0_26 = arith.constant 0 : index
    %60 = vector.load %arg4[%c3, %c0_25, %c0_26] : memref<18x8x256xf32, #tpu.memory_space<vmem>>, vector<1x8x256xf32>
    %61 = vector.shape_cast %60 : vector<1x8x256xf32> to vector<8x256xf32>
    %62 = vector.shape_cast %61 : vector<8x256xf32> to vector<1x8x256xf32>
    %63 = arith.mulf %54, %62 : vector<1x8x256xf32>
    %64 = arith.addf %52, %63 : vector<1x8x256xf32>
    %c15_i32 = arith.constant 15 : i32
    %65 = tpu.dynamic_rotate %32 by %c15_i32 dim 1 : vector<8x256xf32>, i32 -> vector<8x256xf32>
    %66 = vector.shape_cast %65 : vector<8x256xf32> to vector<1x8x256xf32>
    %c4 = arith.constant 4 : index
    %c0_27 = arith.constant 0 : index
    %c0_28 = arith.constant 0 : index
    %67 = vector.load %arg4[%c4, %c0_27, %c0_28] : memref<18x8x256xf32, #tpu.memory_space<vmem>>, vector<1x8x256xf32>
    %68 = vector.shape_cast %67 : vector<1x8x256xf32> to vector<8x256xf32>
    %69 = vector.shape_cast %68 : vector<8x256xf32> to vector<1x8x256xf32>
    %70 = arith.mulf %66, %69 : vector<1x8x256xf32>
    %71 = arith.addf %59, %70 : vector<1x8x256xf32>
    %c5 = arith.constant 5 : index
    %c0_29 = arith.constant 0 : index
    %c0_30 = arith.constant 0 : index
    %72 = vector.load %arg4[%c5, %c0_29, %c0_30] : memref<18x8x256xf32, #tpu.memory_space<vmem>>, vector<1x8x256xf32>
    %73 = vector.shape_cast %72 : vector<1x8x256xf32> to vector<8x256xf32>
    %74 = vector.shape_cast %73 : vector<8x256xf32> to vector<1x8x256xf32>
    %75 = arith.mulf %66, %74 : vector<1x8x256xf32>
    %76 = arith.addf %64, %75 : vector<1x8x256xf32>
    %c1_i32 = arith.constant 1 : i32
    %77 = tpu.dynamic_rotate %32 by %c1_i32 dim 1 : vector<8x256xf32>, i32 -> vector<8x256xf32>
    %78 = vector.shape_cast %77 : vector<8x256xf32> to vector<1x8x256xf32>
    %c6 = arith.constant 6 : index
    %c0_31 = arith.constant 0 : index
    %c0_32 = arith.constant 0 : index
    %79 = vector.load %arg4[%c6, %c0_31, %c0_32] : memref<18x8x256xf32, #tpu.memory_space<vmem>>, vector<1x8x256xf32>
    %80 = vector.shape_cast %79 : vector<1x8x256xf32> to vector<8x256xf32>
    %81 = vector.shape_cast %80 : vector<8x256xf32> to vector<1x8x256xf32>
    %82 = arith.mulf %78, %81 : vector<1x8x256xf32>
    %83 = arith.addf %71, %82 : vector<1x8x256xf32>
    %c7 = arith.constant 7 : index
    %c0_33 = arith.constant 0 : index
    %c0_34 = arith.constant 0 : index
    %84 = vector.load %arg4[%c7, %c0_33, %c0_34] : memref<18x8x256xf32, #tpu.memory_space<vmem>>, vector<1x8x256xf32>
    %85 = vector.shape_cast %84 : vector<1x8x256xf32> to vector<8x256xf32>
    %86 = vector.shape_cast %85 : vector<8x256xf32> to vector<1x8x256xf32>
    %87 = arith.mulf %78, %86 : vector<1x8x256xf32>
    %88 = arith.addf %76, %87 : vector<1x8x256xf32>
    %c255_i32 = arith.constant 255 : i32
    %89 = tpu.dynamic_rotate %32 by %c255_i32 dim 1 : vector<8x256xf32>, i32 -> vector<8x256xf32>
    %90 = vector.shape_cast %89 : vector<8x256xf32> to vector<1x8x256xf32>
    %c10 = arith.constant 10 : index
    %c0_35 = arith.constant 0 : index
    %c0_36 = arith.constant 0 : index
    %91 = vector.load %arg4[%c10, %c0_35, %c0_36] : memref<18x8x256xf32, #tpu.memory_space<vmem>>, vector<1x8x256xf32>
    %92 = vector.shape_cast %91 : vector<1x8x256xf32> to vector<8x256xf32>
    %93 = vector.shape_cast %92 : vector<8x256xf32> to vector<1x8x256xf32>
    %94 = arith.mulf %90, %93 : vector<1x8x256xf32>
    %95 = arith.addf %83, %94 : vector<1x8x256xf32>
    %c11 = arith.constant 11 : index
    %c0_37 = arith.constant 0 : index
    %c0_38 = arith.constant 0 : index
    %96 = vector.load %arg4[%c11, %c0_37, %c0_38] : memref<18x8x256xf32, #tpu.memory_space<vmem>>, vector<1x8x256xf32>
    %97 = vector.shape_cast %96 : vector<1x8x256xf32> to vector<8x256xf32>
    %98 = vector.shape_cast %97 : vector<8x256xf32> to vector<1x8x256xf32>
    %99 = arith.mulf %90, %98 : vector<1x8x256xf32>
    %100 = arith.addf %88, %99 : vector<1x8x256xf32>
    %c241_i32 = arith.constant 241 : i32
    %101 = tpu.dynamic_rotate %32 by %c241_i32 dim 1 : vector<8x256xf32>, i32 -> vector<8x256xf32>
    %102 = vector.shape_cast %101 : vector<8x256xf32> to vector<1x8x256xf32>
    %c12 = arith.constant 12 : index
    %c0_39 = arith.constant 0 : index
    %c0_40 = arith.constant 0 : index
    %103 = vector.load %arg4[%c12, %c0_39, %c0_40] : memref<18x8x256xf32, #tpu.memory_space<vmem>>, vector<1x8x256xf32>
    %104 = vector.shape_cast %103 : vector<1x8x256xf32> to vector<8x256xf32>
    %105 = vector.shape_cast %104 : vector<8x256xf32> to vector<1x8x256xf32>
    %106 = arith.mulf %102, %105 : vector<1x8x256xf32>
    %107 = arith.addf %95, %106 : vector<1x8x256xf32>
    %c13 = arith.constant 13 : index
    %c0_41 = arith.constant 0 : index
    %c0_42 = arith.constant 0 : index
    %108 = vector.load %arg4[%c13, %c0_41, %c0_42] : memref<18x8x256xf32, #tpu.memory_space<vmem>>, vector<1x8x256xf32>
    %109 = vector.shape_cast %108 : vector<1x8x256xf32> to vector<8x256xf32>
    %110 = vector.shape_cast %109 : vector<8x256xf32> to vector<1x8x256xf32>
    %111 = arith.mulf %102, %110 : vector<1x8x256xf32>
    %112 = arith.addf %100, %111 : vector<1x8x256xf32>
    %c240_i32 = arith.constant 240 : i32
    %113 = tpu.dynamic_rotate %32 by %c240_i32 dim 1 : vector<8x256xf32>, i32 -> vector<8x256xf32>
    %114 = vector.shape_cast %113 : vector<8x256xf32> to vector<1x8x256xf32>
    %c14 = arith.constant 14 : index
    %c0_43 = arith.constant 0 : index
    %c0_44 = arith.constant 0 : index
    %115 = vector.load %arg4[%c14, %c0_43, %c0_44] : memref<18x8x256xf32, #tpu.memory_space<vmem>>, vector<1x8x256xf32>
    %116 = vector.shape_cast %115 : vector<1x8x256xf32> to vector<8x256xf32>
    %117 = vector.shape_cast %116 : vector<8x256xf32> to vector<1x8x256xf32>
    %118 = arith.mulf %114, %117 : vector<1x8x256xf32>
    %119 = arith.addf %107, %118 : vector<1x8x256xf32>
    %c15 = arith.constant 15 : index
    %c0_45 = arith.constant 0 : index
    %c0_46 = arith.constant 0 : index
    %120 = vector.load %arg4[%c15, %c0_45, %c0_46] : memref<18x8x256xf32, #tpu.memory_space<vmem>>, vector<1x8x256xf32>
    %121 = vector.shape_cast %120 : vector<1x8x256xf32> to vector<8x256xf32>
    %122 = vector.shape_cast %121 : vector<8x256xf32> to vector<1x8x256xf32>
    %123 = arith.mulf %114, %122 : vector<1x8x256xf32>
    %124 = arith.addf %112, %123 : vector<1x8x256xf32>
    %c239_i32 = arith.constant 239 : i32
    %125 = tpu.dynamic_rotate %32 by %c239_i32 dim 1 : vector<8x256xf32>, i32 -> vector<8x256xf32>
    %126 = vector.shape_cast %125 : vector<8x256xf32> to vector<1x8x256xf32>
    %c16_47 = arith.constant 16 : index
    %c0_48 = arith.constant 0 : index
    %c0_49 = arith.constant 0 : index
    %127 = vector.load %arg4[%c16_47, %c0_48, %c0_49] : memref<18x8x256xf32, #tpu.memory_space<vmem>>, vector<1x8x256xf32>
    %128 = vector.shape_cast %127 : vector<1x8x256xf32> to vector<8x256xf32>
    %129 = vector.shape_cast %128 : vector<8x256xf32> to vector<1x8x256xf32>
    %130 = arith.mulf %126, %129 : vector<1x8x256xf32>
    %131 = arith.addf %119, %130 : vector<1x8x256xf32>
    %c17 = arith.constant 17 : index
    %c0_50 = arith.constant 0 : index
    %c0_51 = arith.constant 0 : index
    %132 = vector.load %arg4[%c17, %c0_50, %c0_51] : memref<18x8x256xf32, #tpu.memory_space<vmem>>, vector<1x8x256xf32>
    %133 = vector.shape_cast %132 : vector<1x8x256xf32> to vector<8x256xf32>
    %134 = vector.shape_cast %133 : vector<8x256xf32> to vector<1x8x256xf32>
    %135 = arith.mulf %126, %134 : vector<1x8x256xf32>
    %136 = arith.addf %124, %135 : vector<1x8x256xf32>
    %cst_52 = arith.constant dense<0.000000e+00> : vector<1x256xf32>
    %137 = vector.multi_reduction <add>, %131, %cst_52 [1] : vector<1x8x256xf32> to vector<1x256xf32>
    %138 = vector.shape_cast %137 : vector<1x256xf32> to vector<1x1x256xf32>
    %c0_53 = arith.constant 0 : index
    %c0_54 = arith.constant 0 : index
    %139 = vector.load %arg6[%c0_53, %c0_54] : memref<3x256xf32, #tpu.memory_space<vmem>>, vector<1x256xf32>
    %140 = vector.shape_cast %139 : vector<1x256xf32> to vector<1x1x256xf32>
    %141 = arith.addf %138, %140 : vector<1x1x256xf32>
    %cst_55 = arith.constant 0.000000e+00 : f32
    %142 = vector.broadcast %cst_55 : f32 to vector<1x1x256xf32>
    %143 = arith.maximumf %141, %142 : vector<1x1x256xf32>
    %cst_56 = arith.constant dense<0.000000e+00> : vector<1x256xf32>
    %144 = vector.multi_reduction <add>, %136, %cst_56 [1] : vector<1x8x256xf32> to vector<1x256xf32>
    %145 = vector.shape_cast %144 : vector<1x256xf32> to vector<1x1x256xf32>
    %c1_57 = arith.constant 1 : index
    %c0_58 = arith.constant 0 : index
    %146 = vector.load %arg6[%c1_57, %c0_58] : memref<3x256xf32, #tpu.memory_space<vmem>>, vector<1x256xf32>
    %147 = vector.shape_cast %146 : vector<1x256xf32> to vector<1x1x256xf32>
    %148 = arith.addf %145, %147 : vector<1x1x256xf32>
    %cst_59 = arith.constant 0.000000e+00 : f32
    %149 = vector.broadcast %cst_59 : f32 to vector<1x1x256xf32>
    %150 = arith.maximumf %148, %149 : vector<1x1x256xf32>
    %c2_60 = arith.constant 2 : index
    %c0_61 = arith.constant 0 : index
    %151 = vector.load %arg6[%c2_60, %c0_61] : memref<3x256xf32, #tpu.memory_space<vmem>>, vector<1x256xf32>
    %152 = vector.shape_cast %143 : vector<1x1x256xf32> to vector<1x256xf32>
    %153 = vector.shape_cast %150 : vector<1x1x256xf32> to vector<1x256xf32>
    %154 = tpu.concatenate %152, %153 in 0 : vector<1x256xf32>, vector<1x256xf32> -> vector<2x256xf32>
    %c4_62 = arith.constant 4 : index
    %c0_63 = arith.constant 0 : index
    %c0_64 = arith.constant 0 : index
    %155 = vector.load %arg5[%c4_62, %c0_63, %c0_64] : memref<9x2x256xf32, #tpu.memory_space<vmem>>, vector<1x2x256xf32>
    %156 = vector.shape_cast %155 : vector<1x2x256xf32> to vector<2x256xf32>
    %157 = arith.mulf %154, %156 : vector<2x256xf32>
    %c17_i32_65 = arith.constant 17 : i32
    %158 = tpu.dynamic_rotate %154 by %c17_i32_65 dim 1 : vector<2x256xf32>, i32 -> vector<2x256xf32>
    %c0_66 = arith.constant 0 : index
    %c0_67 = arith.constant 0 : index
    %c0_68 = arith.constant 0 : index
    %159 = vector.load %arg5[%c0_66, %c0_67, %c0_68] : memref<9x2x256xf32, #tpu.memory_space<vmem>>, vector<1x2x256xf32>
    %160 = vector.shape_cast %159 : vector<1x2x256xf32> to vector<2x256xf32>
    %161 = arith.mulf %158, %160 : vector<2x256xf32>
    %162 = arith.addf %157, %161 : vector<2x256xf32>
    %c16_i32_69 = arith.constant 16 : i32
    %163 = tpu.dynamic_rotate %154 by %c16_i32_69 dim 1 : vector<2x256xf32>, i32 -> vector<2x256xf32>
    %c1_70 = arith.constant 1 : index
    %c0_71 = arith.constant 0 : index
    %c0_72 = arith.constant 0 : index
    %164 = vector.load %arg5[%c1_70, %c0_71, %c0_72] : memref<9x2x256xf32, #tpu.memory_space<vmem>>, vector<1x2x256xf32>
    %165 = vector.shape_cast %164 : vector<1x2x256xf32> to vector<2x256xf32>
    %166 = arith.mulf %163, %165 : vector<2x256xf32>
    %167 = arith.addf %162, %166 : vector<2x256xf32>
    %c15_i32_73 = arith.constant 15 : i32
    %168 = tpu.dynamic_rotate %154 by %c15_i32_73 dim 1 : vector<2x256xf32>, i32 -> vector<2x256xf32>
    %c2_74 = arith.constant 2 : index
    %c0_75 = arith.constant 0 : index
    %c0_76 = arith.constant 0 : index
    %169 = vector.load %arg5[%c2_74, %c0_75, %c0_76] : memref<9x2x256xf32, #tpu.memory_space<vmem>>, vector<1x2x256xf32>
    %170 = vector.shape_cast %169 : vector<1x2x256xf32> to vector<2x256xf32>
    %171 = arith.mulf %168, %170 : vector<2x256xf32>
    %172 = arith.addf %167, %171 : vector<2x256xf32>
    %c1_i32_77 = arith.constant 1 : i32
    %173 = tpu.dynamic_rotate %154 by %c1_i32_77 dim 1 : vector<2x256xf32>, i32 -> vector<2x256xf32>
    %c3_78 = arith.constant 3 : index
    %c0_79 = arith.constant 0 : index
    %c0_80 = arith.constant 0 : index
    %174 = vector.load %arg5[%c3_78, %c0_79, %c0_80] : memref<9x2x256xf32, #tpu.memory_space<vmem>>, vector<1x2x256xf32>
    %175 = vector.shape_cast %174 : vector<1x2x256xf32> to vector<2x256xf32>
    %176 = arith.mulf %173, %175 : vector<2x256xf32>
    %177 = arith.addf %172, %176 : vector<2x256xf32>
    %c255_i32_81 = arith.constant 255 : i32
    %178 = tpu.dynamic_rotate %154 by %c255_i32_81 dim 1 : vector<2x256xf32>, i32 -> vector<2x256xf32>
    %c5_82 = arith.constant 5 : index
    %c0_83 = arith.constant 0 : index
    %c0_84 = arith.constant 0 : index
    %179 = vector.load %arg5[%c5_82, %c0_83, %c0_84] : memref<9x2x256xf32, #tpu.memory_space<vmem>>, vector<1x2x256xf32>
    %180 = vector.shape_cast %179 : vector<1x2x256xf32> to vector<2x256xf32>
    %181 = arith.mulf %178, %180 : vector<2x256xf32>
    %182 = arith.addf %177, %181 : vector<2x256xf32>
    %c241_i32_85 = arith.constant 241 : i32
    %183 = tpu.dynamic_rotate %154 by %c241_i32_85 dim 1 : vector<2x256xf32>, i32 -> vector<2x256xf32>
    %c6_86 = arith.constant 6 : index
    %c0_87 = arith.constant 0 : index
    %c0_88 = arith.constant 0 : index
    %184 = vector.load %arg5[%c6_86, %c0_87, %c0_88] : memref<9x2x256xf32, #tpu.memory_space<vmem>>, vector<1x2x256xf32>
    %185 = vector.shape_cast %184 : vector<1x2x256xf32> to vector<2x256xf32>
    %186 = arith.mulf %183, %185 : vector<2x256xf32>
    %187 = arith.addf %182, %186 : vector<2x256xf32>
    %c240_i32_89 = arith.constant 240 : i32
    %188 = tpu.dynamic_rotate %154 by %c240_i32_89 dim 1 : vector<2x256xf32>, i32 -> vector<2x256xf32>
    %c7_90 = arith.constant 7 : index
    %c0_91 = arith.constant 0 : index
    %c0_92 = arith.constant 0 : index
    %189 = vector.load %arg5[%c7_90, %c0_91, %c0_92] : memref<9x2x256xf32, #tpu.memory_space<vmem>>, vector<1x2x256xf32>
    %190 = vector.shape_cast %189 : vector<1x2x256xf32> to vector<2x256xf32>
    %191 = arith.mulf %188, %190 : vector<2x256xf32>
    %192 = arith.addf %187, %191 : vector<2x256xf32>
    %c239_i32_93 = arith.constant 239 : i32
    %193 = tpu.dynamic_rotate %154 by %c239_i32_93 dim 1 : vector<2x256xf32>, i32 -> vector<2x256xf32>
    %c8_94 = arith.constant 8 : index
    %c0_95 = arith.constant 0 : index
    %c0_96 = arith.constant 0 : index
    %194 = vector.load %arg5[%c8_94, %c0_95, %c0_96] : memref<9x2x256xf32, #tpu.memory_space<vmem>>, vector<1x2x256xf32>
    %195 = vector.shape_cast %194 : vector<1x2x256xf32> to vector<2x256xf32>
    %196 = arith.mulf %193, %195 : vector<2x256xf32>
    %197 = arith.addf %192, %196 : vector<2x256xf32>
    %cst_97 = arith.constant dense<0.000000e+00> : vector<256xf32>
    %198 = vector.multi_reduction <add>, %197, %cst_97 [0] : vector<2x256xf32> to vector<256xf32>
    %199 = vector.shape_cast %198 : vector<256xf32> to vector<1x256xf32>
    %200 = arith.addf %199, %151 : vector<1x256xf32>
    %201 = arith.negf %200 : vector<1x256xf32>
    %202 = math.exp %201 : vector<1x256xf32>
    %cst_98 = arith.constant 1.000000e+00 : f32
    %203 = vector.broadcast %cst_98 : f32 to vector<1x256xf32>
    %204 = arith.addf %203, %202 : vector<1x256xf32>
    %205 = arith.divf %203, %204 : vector<1x256xf32>
    %206 = vector.shape_cast %31 : vector<1x8x256xf32> to vector<8x256xf32>
    %207 = vector.broadcast %205 : vector<1x256xf32> to vector<8x256xf32>
    %208 = arith.mulf %206, %207 : vector<8x256xf32>
    %c0_99 = arith.constant 0 : index
    %c0_100 = arith.constant 0 : index
    %c0_101 = arith.constant 0 : index
    %209 = vector.load %arg7[%c0_99, %c0_100, %c0_101] : memref<1x8x256xf32, #tpu.memory_space<vmem>>, vector<1x8x256xf32>
    %210 = vector.shape_cast %209 : vector<1x8x256xf32> to vector<8x256xf32>
    %211 = vector.shape_cast %208 : vector<8x256xf32> to vector<1x8x256xf32>
    tpu.vector_store %arg7[%c0_99, %c0_100, %c0_101], %211 {strides = array<i32>} : memref<1x8x256xf32, #tpu.memory_space<vmem>>, vector<1x8x256xf32>,
    return
  }
  func.func @transform_0(%arg0: i32) -> (i32, i32, i32) {
    %c0_i32 = arith.constant 0 : i32
    %c0_i32_0 = arith.constant 0 : i32
    %c0_i32_1 = arith.constant 0 : i32
    return %arg0, %c0_i32, %c0_i32_0 : i32, i32, i32
  }
  func.func @transform_1(%arg0: i32) -> (i32, i32) {
    %c0_i32 = arith.constant 0 : i32
    %c0_i32_0 = arith.constant 0 : i32
    %c0_i32_1 = arith.constant 0 : i32
    return %c0_i32, %c0_i32_0 : i32, i32
  }
  func.func @transform_2(%arg0: i32) -> (i32, i32) {
    %c0_i32 = arith.constant 0 : i32
    %c0_i32_0 = arith.constant 0 : i32
    %c0_i32_1 = arith.constant 0 : i32
    return %c0_i32, %c0_i32_0 : i32, i32
  }
  func.func @transform_3(%arg0: i32) -> (i32, i32, i32) {
    %c0_i32 = arith.constant 0 : i32
    %c0_i32_0 = arith.constant 0 : i32
    %c0_i32_1 = arith.constant 0 : i32
    %c0_i32_2 = arith.constant 0 : i32
    return %c0_i32, %c0_i32_0, %c0_i32_1 : i32, i32, i32
  }
  func.func @transform_4(%arg0: i32) -> (i32, i32, i32) {
    %c0_i32 = arith.constant 0 : i32
    %c0_i32_0 = arith.constant 0 : i32
    %c0_i32_1 = arith.constant 0 : i32
    %c0_i32_2 = arith.constant 0 : i32
    return %c0_i32, %c0_i32_0, %c0_i32_1 : i32, i32, i32
  }
  func.func @transform_5(%arg0: i32) -> (i32, i32) {
    %c0_i32 = arith.constant 0 : i32
    %c0_i32_0 = arith.constant 0 : i32
    %c0_i32_1 = arith.constant 0 : i32
    return %c0_i32, %c0_i32_0 : i32, i32
  }
  func.func @transform_6(%arg0: i32) -> (i32, i32, i32) {
    %c0_i32 = arith.constant 0 : i32
    %c0_i32_0 = arith.constant 0 : i32
    %c0_i32_1 = arith.constant 0 : i32
    return %arg0, %c0_i32, %c0_i32_0 : i32, i32, i32
  }
}

</mosaic_0001>

<bundles_post_ra>
// kernel: attention_block.1
= control target key start
LH: loop header
LB: loop body
LE: loop exit
PB: predicated region body
PF: predicated region fallthrough
CT: control target
= control target key end

     0   :  { %11 = vsyncpa [#allocation3], 0  ;;  %s1030_s21 = smov 0   ;;  %s1322_s0 = inlined_call_operand.vmem [shape: f32[2,8,256], index: 0, kind: input, shape index: {}]   ;;  %s1323_s1 = inlined_call_operand.vmem [shape: f32[24,8], index: 1, kind: input, shape index: {}]   ;;  %s1324_s2 = inlined_call_operand.vmem [shape: f32[8,1], index: 2, kind: input, shape index: {}]   ;;  %s1325_s3 = inlined_call_operand.vmem [shape: f32[18,8,256], index: 3, kind: input, shape index: {}]   ;;  %s1326_s4 = inlined_call_operand.hbm [shape: f32[9,2,256], index: 4, kind: input, shape index: {}]   ;;  %s1327_s5 = inlined_call_operand.vmem [shape: f32[3,256], index: 5, kind: input, shape index: {}]   ;;  %s1328_s6 = inlined_call_operand.vmem [shape: f32[2,8,256], index: 6, kind: output, shape index: {}]  }
   0x1 LB: > { %s199_s24 = sshll.u32 %s1326_s4, 4  ;;  %s843_s25 = sadd.s32 4294967295, %s981_s21   ;;  %s981_s21 = sphi %s1030_s21, %s17_s21   ;;  %s200_s24 = int_to_ptr.hbm [resolvable:$true] %s199_s24 }
   0x2   : > { %p845_p0 = scmp.ge.s32.totalorder %s981_s21, 1  ;;  %p179_p1 = scmp.lt.s32.totalorder %s981_s21, 3 }
   0x3   : > { %p905_p2 = scmp.eq.s32.totalorder %s843_s25, 0  ;;  %s983_s26 = smov [#allocation2]  }
   0x4   : > { %p180_p3 = pnand %p845_p0, %p179_p1  ;;  %s201_s27 = sshll.u32 %s983_s26, 4  ;;  %s202_s27 = int_to_ptr.vmem [resolvable:$true] %s201_s27 }
   0x5   : > { %s984_s28 = smov 64   ;;  %s985_s29 = smov 4  }
   0x6   : > { %p901_p4 = pneg %p180_p3  ;;  %228 = sbr.rel (%p180_p3) target bundleno = 815 (0x32f), region = 44 }
   0x8   : > { %p902_p5 = pnand %p905_p2, %p901_p4 }
   0xa   : > { %904 = dma.hbm_to_vmem [thread:$0]  (!%p902_p5), %s200_s24, 576, %s202_s27, [#allocation3], %s984_s28, %s984_s28, %s985_s29  }
   0xb   : > { %976 = dma.done.wait (%p905_p2), [#allocation3], 576  }
   0xc   : > { %978 = vsyncadd (%p905_p2), [#allocation3], 4294966720  ;;  %p259_p6 = scmp.lt.s32.totalorder %s843_s25, 1  ;;  %v275_v3 = vld [vmem:[%s1323_s1] sm:$0xff]  ;;  %vm279_vm0 = vcmask 64512   ;;  %v277_v17 = vld [vmem:[%s1323_s1 + $0x10] sm:$0xff]  ;;  %v336_v45 = vlaneseq }
   0xd   : > { %v276_v13 = vld [vmem:[%s1323_s1 + $0x8] sm:$0x1]  ;;  %v986_v21 = vmov 0   ;;  %v294_v22 = vld [vmem:[%s1324_s2] sm:$0xff]  ;;  %s987_s18 = smov 16   ;;  %s988_s19 = smov 17  }
   0xe   : > { %s1330_s25 = smov (!%p259_p6, %s843_s25), 1  ;;  %927 = vset.pattern.permute.xlu1 %v986_v21  ;;  %928 = vset.pattern.permute.xlu0 %v986_v21  ;;  %s989_s20 = smov 113   ;;  %v1097_v46 = vand.u32 127, %v336_v45  ;;  %v342_v50 = vld [vmem:[%s1325_s3 + $0x8] sm:$0xff]  ;;  %v341_v52 = vld [vmem:[%s1325_s3] sm:$0xff]  ;;  %v860_v53 = vld [vmem:[%s1325_s3 + $0x18] sm:$0xff] }
   0xf   : > { %s895_s30 = sshll.u32 %s1330_s25, 4  ;;  %s990_s22 = smov 15   ;;  %v856_v56 = vld [vmem:[%s1325_s3 + $0x88] sm:$0xff]  ;;  %v859_v57 = vld [vmem:[%s1325_s3 + $0x10] sm:$0xff]  ;;  %v855_v58 = vld [vmem:[%s1325_s3 + $0x80] sm:$0xff]  ;;  %vm554_vm13 = vcmask 1040384  }
  0x10   : > { %s263_s9 = scalar_lea.vmem %s1322_s0, %s895_s30  ;;  %s991_s23 = smov 112   ;;  %vm338_vm5 = vcmp.lt.s32.totalorder %v1097_v46, 17  ;;  %vm358_vm6 = vcmp.lt.s32.totalorder %v1097_v46, 16  ;;  %v858_v59 = vld [vmem:[%s1325_s3 + $0x98] sm:$0xff]  ;;  %v857_v61 = vld [vmem:[%s1325_s3 + $0x90] sm:$0xff]  ;;  %vm379_vm7 = vcmp.lt.s32.totalorder %v1097_v46, 15 }
  0x11   : > { %v269_v0 = vld [vmem:[%s263_s9] sm:$0xff]  ;;  %v270_v1 = vld [vmem:[%s263_s9 + $0x8] sm:$0xff]  ;;  %s992_s24 = smov 1   ;;  %s993_s26 = smov 127   ;;  %vm400_vm8 = vcmp.lt.s32.totalorder %v1097_v46, 1  ;;  %vm421_vm9 = vcmp.lt.s32.totalorder %v1097_v46, 127 }
  0x12   : > { %v271_v2 = vadd.f32 %v270_v1, %v269_v0  ;;  %s994_s27 = smov 111   ;;  %v867_v21 = vld [vmem:[%s1325_s3 + $0x50] sm:$0xff]  ;;  %vm442_vm10 = vcmp.lt.s32.totalorder %v1097_v46, 113  ;;  %vm463_vm11 = vcmp.lt.s32.totalorder %v1097_v46, 112  ;;  %vm484_vm12 = vcmp.lt.s32.totalorder %v1097_v46, 111 }
  0x13   : > { %vm710_vm14 = vcmask 1041408   ;;  %v890_v46 = vld [vmem:[%s1327_s5 + $0x2] ss:$4 sm:$0x3] }
  0x14   : > { %272 = vadd.xlane.f32.xlu0 %v271_v2 }
  0x87   : > { %v273_v4 = vpop.xlane.xlu0 %272 }
  0x88   : > { %v274_v5 = vmul.f32 0.00390625, %v273_v4 }
  0x8a   : > { %v278_v6 = vmul.f32 %v275_v3, %v274_v5  ;;  %v862_v5 = vld [vmem:[%s1325_s3 + $0x28] sm:$0xff] }
  0x8c   : > { %v280_v7 = vsel %vm279_vm0, %v278_v6, 0.0  ;;  %v863_v6 = vld [vmem:[%s1325_s3 + $0x30] sm:$0xff] }
  0x8d   : > { %v281_v8 = vrot.slane %v280_v7, 4 }
  0x8f   : > { %v282_v9 = vadd.f32 %v281_v8, %v280_v7 }
  0x91   : > { %v283_v10 = vrot.slane %v282_v9, 2 }
  0x93   : > { %v284_v11 = vadd.f32 %v283_v10, %v282_v9  ;;  %v864_v10 = vld [vmem:[%s1325_s3 + $0x38] sm:$0xff] }
  0x95   : > { %v285_v12 = vrot.slane %v284_v11, 1 }
  0x97   : > { %v286_v14 = vadd.f32 %v285_v12, %v284_v11 }
  0x99   : > { %v287_v15 = vadd.f32 %v286_v14, %v276_v13  ;;  %v866_v14 = vld [vmem:[%s1325_s3 + $0x48] sm:$0xff] }
  0x9b   : > { %v288_v16 = vmax.f32 %v287_v15, 0.0  ;;  %v868_v15 = vld [vmem:[%s1325_s3 + $0x58] sm:$0xff] }
  0x9d   : > { %v289_v18 = vperm.slane %v288_v16, 0 }
  0x9f   : > { %v290_v19 = vmul.f32 %v289_v18, %v277_v17 }
  0xa1   : > { %v291_v20 = vsel %vm279_vm0, %v290_v19, 0.0 }
  0xa2   : > { %292 = vadd.xlane.f32.xlu0 %v291_v20  ;;  %v865_v20 = vld [vmem:[%s1325_s3 + $0x40] sm:$0xff] }
 0x115   : > { %v293_v23 = vpop.xlane.xlu0 %292 }
 0x116   : > { %v295_v24 = vadd.f32 %v294_v22, %v293_v23 }
 0x118   : > { %v854_v25 = vmul.f32 -1.442695, %v295_v24 }
 0x11a   : > { %929 = vpow2.f32 %v854_v25 }
 0x120   : > { %v930_v26 = vpop.eup %929 }
 0x121   : > { %v299_v27 = vadd.f32 1.0, %v930_v26  ;;  %v870_v26 = vld [vmem:[%s1325_s3 + $0x68] sm:$0xff] }
 0x123   : > { %931 = vrcp.f32 %v299_v27  ;;  %v311_v31 = vand.u32 2147483648, %v299_v27  ;;  %v309_v33 = vand.u32 2147483647, %v299_v27  ;;  %vm305_vm2 = vweird.f32 %v299_v27 }
 0x125   : > { %v312_v35 = vor.u32 1.1754944e-38, %v311_v31  ;;  %vm310_vm4 = vcmp.eq.f32.partialorder %v309_v33, 8.507059e+37  ;;  %v869_v33 = vld [vmem:[%s1325_s3 + $0x60] sm:$0xff] }
 0x129   : > { %v932_v28 = vpop.eup %931 }
 0x12a   : > { %v301_v29 = vmul.f32 %v932_v28, %v299_v27  ;;  %vm306_vm1 = vweird.f32 %v932_v28  ;;  %v872_v27 = vld [vmem:[%s1325_s3 + $0x78] sm:$0xff] }
 0x12b   : > { %vm307_vm3 = vmor %vm305_vm2, %vm306_vm1 }
 0x12c   : > { %v302_v30 = vsub.f32 1.0, %v301_v29 }
 0x12e   : > { %v303_v32 = vmul.f32 %v932_v28, %v302_v30 }
 0x130   : > { %v304_v34 = vadd.f32 %v932_v28, %v303_v32 }
 0x132   : > { %v308_v36 = vsel %vm307_vm3, %v932_v28, %v304_v34  ;;  %v871_v34 = vld [vmem:[%s1325_s3 + $0x70] sm:$0xff] }
 0x133   : > { %v313_v37 = vsel %vm310_vm4, %v312_v35, %v308_v36  ;;  %v558_v36 = vld [vmem:[#allocation2 + $0x10] sm:$0xf] }
 0x134   : > { %317 = vperm.xlu1 %927, %v313_v37   ;;  %560 = vst [vmem:[#allocation1] ss:$4 sm:$0xff] %v558_v36  ;;  %v886_v36 = vld [vmem:[%s1325_s3 + $0x108] sm:$0xff] }
 0x1a6   : > { %v318_v38 = vpop.permute.xlu1 %317 }
 0x1a7   : > { %v1061_v39 = vmul.f32 %v318_v38, %v269_v0  ;;  %v1063_v40 = vmul.f32 %v318_v38, %v270_v1  ;;  %v861_v0 = vld [vmem:[%s1325_s3 + $0x20] sm:$0xff] }
 0x1a9   : > { %356 = vrot.lane.b32.xlu0 %v1063_v40, %s987_s18  ;;  %334 = vrot.lane.b32.xlu2 %v1063_v40, %s988_s19  ;;  %v326_v2 = vmul.f32 %v856_v56, %v1063_v40  ;;  %v331_v8 = vmul.f32 %v858_v59, %v1063_v40  ;;  %v325_v9 = vmul.f32 %v855_v58, %v1061_v39 }
 0x1aa   : > { %332 = vrot.lane.b32.xlu1 %v1061_v39, %s988_s19  ;;  %v330_v11 = vmul.f32 %v857_v61, %v1061_v39 }
 0x1b1   : > { %438 = vrot.lane.b32.xlu0 %v1061_v39, %s989_s20  ;;  %354 = vrot.lane.b32.xlu2 %v1061_v39, %s987_s18 }
 0x1b2   : > { %375 = vrot.lane.b32.xlu1 %v1061_v39, %s990_s22 }
 0x1b9   : > { %461 = vrot.lane.b32.xlu0 %v1063_v40, %s991_s23  ;;  %377 = vrot.lane.b32.xlu2 %v1063_v40, %s990_s22 }
 0x1ba   : > { %396 = vrot.lane.b32.xlu1 %v1061_v39, %s992_s24 }
 0x1c1   : > { %398 = vrot.lane.b32.xlu2 %v1063_v40, %s992_s24 }
 0x1c2   : > { %417 = vrot.lane.b32.xlu1 %v1061_v39, %s993_s26 }
 0x1c9   : > { %419 = vrot.lane.b32.xlu2 %v1063_v40, %s993_s26 }
 0x1ca   : > { %440 = vrot.lane.b32.xlu1 %v1063_v40, %s989_s20 }
 0x1d1   : > { %459 = vrot.lane.b32.xlu2 %v1061_v39, %s991_s23 }
 0x1d2   : > { %480 = vrot.lane.b32.xlu1 %v1061_v39, %s994_s27 }
 0x1d9   : > { %482 = vrot.lane.b32.xlu2 %v1063_v40, %s994_s27 }
 0x203   : > { %v335_v41 = vpop.permute.xlu2 %334 }
 0x20b   : > { %v355_v42 = vpop.permute.xlu2 %354 }
 0x213   : > { %v378_v43 = vpop.permute.xlu2 %377 }
 0x21b   : > { %v399_v48 = vpop.permute.xlu2 %398  ;;  %v357_v49 = vpop.permute.xlu0 %356 }
 0x21c   : > { %v333_v44 = vpop.permute.xlu1 %332  ;;  %v360_v1 = vsel %vm358_vm6, %v357_v49, %v355_v42  ;;  %v359_v7 = vsel %vm358_vm6, %v355_v42, %v357_v49  ;;  %v874_v42 = vld [vmem:[%s1325_s3 + $0xa8] sm:$0xff] }
 0x21d   : > { %v339_v51 = vsel %vm338_vm5, %v333_v44, %v335_v41  ;;  %v340_v54 = vsel %vm338_vm5, %v335_v41, %v333_v44  ;;  %v364_v17 = vmul.f32 %v861_v0, %v360_v1  ;;  %v365_v23 = vmul.f32 %v862_v5, %v359_v7  ;;  %v879_v5 = vld [vmem:[%s1325_s3 + $0xd0] sm:$0xff] }
 0x21e   : > { %v344_v60 = vmul.f32 %v342_v50, %v339_v51  ;;  %v343_v62 = vmul.f32 %v341_v52, %v340_v54  ;;  %v351_v63 = vmul.f32 %v860_v53, %v339_v51  ;;  %v350_v3 = vmul.f32 %v859_v57, %v340_v54  ;;  %v873_v53 = vld [vmem:[%s1325_s3 + $0xa0] sm:$0xff]  ;;  %v875_v54 = vld [vmem:[%s1325_s3 + $0xb0] sm:$0xff] }
 0x21f   : > { %v371_v24 = vmul.f32 %v863_v6, %v360_v1  ;;  %v372_v30 = vmul.f32 %v864_v10, %v359_v7  ;;  %v880_v6 = vld [vmem:[%s1325_s3 + $0xd8] sm:$0xff] }
 0x220   : > { %v346_v12 = vadd.f32 %v344_v60, %v326_v2  ;;  %v345_v18 = vadd.f32 %v343_v62, %v325_v9  ;;  %v353_v19 = vadd.f32 %v351_v63, %v331_v8  ;;  %v352_v25 = vadd.f32 %v350_v3, %v330_v11  ;;  %v877_v63 = vld [vmem:[%s1325_s3 + $0xc0] sm:$0xff] }
 0x222   : > { %v367_v37 = vadd.f32 %v365_v23, %v346_v12  ;;  %v374_v45 = vadd.f32 %v372_v30, %v353_v19  ;;  %v373_v50 = vadd.f32 %v371_v24, %v352_v25  ;;  %v883_v25 = vld [vmem:[%s1325_s3 + $0xf0] sm:$0xff] }
 0x223   : > { %v420_v4 = vpop.permute.xlu2 %419  ;;  %v1151_v13 = vpop.permute.xlu0 %438 }
 0x224   : > { %v376_v47 = vpop.permute.xlu1 %375 }
 0x225   : > { %v380_v16 = vsel %vm379_vm7, %v376_v47, %v378_v43  ;;  %v381_v22 = vsel %vm379_vm7, %v378_v43, %v376_v47  ;;  %v876_v43 = vld [vmem:[%s1325_s3 + $0xb8] sm:$0xff]  ;;  %v366_v47 = vadd.f32 %v364_v17, %v345_v18 }
 0x226   : > { %v386_v31 = vmul.f32 %v866_v14, %v380_v16  ;;  %v393_v32 = vmul.f32 %v868_v15, %v380_v16  ;;  %v385_v38 = vmul.f32 %v865_v20, %v381_v22  ;;  %v392_v41 = vmul.f32 %v867_v21, %v381_v22  ;;  %v882_v20 = vld [vmem:[%s1325_s3 + $0xe8] sm:$0xff]  ;;  %v884_v21 = vld [vmem:[%s1325_s3 + $0xf8] sm:$0xff] }
 0x228   : > { %v388_v56 = vadd.f32 %v386_v31, %v367_v37  ;;  %v395_v57 = vadd.f32 %v393_v32, %v374_v45  ;;  %v387_v60 = vadd.f32 %v385_v38, %v366_v47  ;;  %v394_v61 = vadd.f32 %v392_v41, %v373_v50  ;;  %v887_v37 = vld [vmem:[%s1325_s3 + $0x110] sm:$0xff]  ;;  %v888_v38 = vld [vmem:[%s1325_s3 + $0x118] sm:$0xff] }
 0x22b   : > { %v460_v62 = vpop.permute.xlu2 %459  ;;  %v462_v7 = vpop.permute.xlu0 %461 }
 0x22c   : > { %v397_v55 = vpop.permute.xlu1 %396  ;;  %v465_v22 = vsel %vm463_vm11, %v462_v7, %v460_v62 }
 0x22d   : > { %v401_v28 = vsel %vm400_vm8, %v397_v55, %v399_v48  ;;  %v402_v35 = vsel %vm400_vm8, %v399_v48, %v397_v55  ;;  %v470_v31 = vmul.f32 %v882_v20, %v465_v22  ;;  %v477_v32 = vmul.f32 %v884_v21, %v465_v22 }
 0x22e   : > { %v407_v49 = vmul.f32 %v870_v26, %v401_v28  ;;  %v414_v48 = vmul.f32 %v872_v27, %v401_v28  ;;  %v406_v51 = vmul.f32 %v869_v33, %v402_v35  ;;  %v413_v52 = vmul.f32 %v871_v34, %v402_v35  ;;  %v885_v33 = vld [vmem:[%s1325_s3 + $0x100] sm:$0xff] }
 0x22f   : > { %v464_v26 = vsel %vm463_vm11, %v460_v62, %v462_v7 }
 0x230   : > { %v409_v0 = vadd.f32 %v407_v49, %v388_v56  ;;  %v416_v1 = vadd.f32 %v414_v48, %v395_v57  ;;  %v408_v8 = vadd.f32 %v406_v51, %v387_v60  ;;  %v415_v9 = vadd.f32 %v413_v52, %v394_v61 }
 0x231   : > { %v476_v35 = vmul.f32 %v883_v25, %v464_v26 }
 0x233   : > { %v483_v41 = vpop.permute.xlu2 %482 }
 0x234   : > { %v418_v29 = vpop.permute.xlu1 %417 }
 0x235   : > { %v423_v44 = vsel %vm421_vm9, %v420_v4, %v418_v29  ;;  %v422_v55 = vsel %vm421_vm9, %v418_v29, %v420_v4  ;;  %v878_v4 = vld [vmem:[%s1325_s3 + $0xc8] sm:$0xff] }
 0x236   : > { %v428_v58 = vmul.f32 %v874_v42, %v423_v44  ;;  %v435_v59 = vmul.f32 %v876_v43, %v423_v44  ;;  %v427_v2 = vmul.f32 %v873_v53, %v422_v55  ;;  %v434_v3 = vmul.f32 %v875_v54, %v422_v55 }
 0x238   : > { %v430_v11 = vadd.f32 %v428_v58, %v409_v0  ;;  %v437_v12 = vadd.f32 %v435_v59, %v416_v1  ;;  %v429_v23 = vadd.f32 %v427_v2, %v408_v8  ;;  %v436_v24 = vadd.f32 %v434_v3, %v415_v9  ;;  %v513_v2 = vld [vmem:[%s1327_s5] ss:$4 sm:$0x3]  ;;  %v889_v3 = vld [vmem:[%s1327_s5 + $0x1] ss:$4 sm:$0x3] }
 0x23c   : > { %v441_v10 = vpop.permute.xlu1 %440 }
 0x23d   : > { %v443_v14 = vsel %vm442_vm10, %v1151_v13, %v441_v10  ;;  %v444_v15 = vsel %vm442_vm10, %v441_v10, %v1151_v13  ;;  %v881_v13 = vld [vmem:[%s1325_s3 + $0xe0] sm:$0xff] }
 0x23e   : > { %v448_v16 = vmul.f32 %v877_v63, %v443_v14  ;;  %v449_v17 = vmul.f32 %v878_v4, %v444_v15  ;;  %v455_v18 = vmul.f32 %v879_v5, %v443_v14  ;;  %v456_v19 = vmul.f32 %v880_v6, %v444_v15 }
 0x23f   : > { %v469_v34 = vmul.f32 %v881_v13, %v464_v26  ;;  %v516_v14 = vperm.slane %v513_v2, 1  ;;  %v538_v15 = vperm.slane %v889_v3, 0 }
 0x240   : > { %v451_v27 = vadd.f32 %v449_v17, %v430_v11  ;;  %v458_v28 = vadd.f32 %v456_v19, %v437_v12  ;;  %v450_v29 = vadd.f32 %v448_v16, %v429_v23  ;;  %v457_v30 = vadd.f32 %v455_v18, %v436_v24 }
 0x241   : > { %v515_v12 = vperm.slane %v513_v2, 0  ;;  %v539_v16 = vperm.slane %v889_v3, 1 }
 0x242   : > { %v472_v42 = vadd.f32 %v470_v31, %v451_v27  ;;  %v479_v43 = vadd.f32 %v477_v32, %v458_v28  ;;  %v471_v45 = vadd.f32 %v469_v34, %v450_v29  ;;  %v478_v47 = vadd.f32 %v476_v35, %v457_v30 }
 0x244   : > { %v481_v44 = vpop.permute.xlu1 %480 }
 0x245   : > { %v485_v49 = vsel %vm484_vm12, %v481_v44, %v483_v41  ;;  %v486_v48 = vsel %vm484_vm12, %v483_v41, %v481_v44  ;;  %v609_v44 = vld [vmem:[#allocation2 + $0x8] sm:$0xf] }
 0x246   : > { %v490_v50 = vmul.f32 %v885_v33, %v485_v49  ;;  %v491_v51 = vmul.f32 %v886_v36, %v486_v48  ;;  %v497_v52 = vmul.f32 %v887_v37, %v485_v49  ;;  %v498_v53 = vmul.f32 %v888_v38, %v486_v48  ;;  %v561_v36 = vld.sshfl [vmem:[#allocation1] sm:$0xff pattern:$0x73625140]  ;;  %v562_v37 = vld.sshfl [vmem:[#allocation1 + $0x8] sm:$0xff pattern:$0x73625140] }
 0x247   : > { %v573_v38 = vld [vmem:[#allocation2] sm:$0xf]  ;;  %v627_v49 = vld [vmem:[#allocation2 + $0xc] sm:$0xf] }
 0x248   : > { %v492_v54 = vadd.f32 %v490_v50, %v471_v45  ;;  %v493_v55 = vadd.f32 %v491_v51, %v472_v42  ;;  %v499_v56 = vadd.f32 %v497_v52, %v478_v47  ;;  %v500_v57 = vadd.f32 %v498_v53, %v479_v43  ;;  %575 = vst [vmem:[#allocation1] ss:$4 sm:$0xff] %v573_v38  ;;  %v591_v43 = vld [vmem:[#allocation2 + $0x4] sm:$0xf]  ;;  %v645_v51 = vld [vmem:[#allocation2 + $0x14] sm:$0xf] }
 0x24a   : > { %v501_v58 = vrot.slane %v492_v54, 4  ;;  %v507_v59 = vrot.slane %v493_v55, 4  ;;  %v523_v60 = vrot.slane %v499_v56, 4  ;;  %v529_v61 = vrot.slane %v500_v57, 4 }
 0x24c   : > { %v502_v62 = vadd.f32 %v501_v58, %v492_v54  ;;  %v508_v63 = vadd.f32 %v507_v59, %v493_v55  ;;  %v524_v0 = vadd.f32 %v523_v60, %v499_v56  ;;  %v530_v1 = vadd.f32 %v529_v61, %v500_v57  ;;  %v663_v54 = vld [vmem:[#allocation2 + $0x18] sm:$0xf]  ;;  %v681_v57 = vld [vmem:[#allocation2 + $0x1c] sm:$0xf] }
 0x24e   : > { %v503_v4 = vrot.slane %v502_v62, 2  ;;  %v509_v5 = vrot.slane %v508_v63, 2  ;;  %v525_v6 = vrot.slane %v524_v0, 2  ;;  %v531_v7 = vrot.slane %v530_v1, 2 }
 0x24f   : > { %v576_v41 = vld.sshfl [vmem:[#allocation1] sm:$0xff pattern:$0x73625140]  ;;  %v577_v42 = vld.sshfl [vmem:[#allocation1 + $0x8] sm:$0xff pattern:$0x73625140] }
 0x250   : > { %v504_v8 = vadd.f32 %v503_v4, %v502_v62  ;;  %v510_v9 = vadd.f32 %v509_v5, %v508_v63  ;;  %v526_v10 = vadd.f32 %v525_v6, %v524_v0  ;;  %v532_v11 = vadd.f32 %v531_v7, %v530_v1  ;;  %593 = vst [vmem:[#allocation1] ss:$4 sm:$0xff] %v591_v43  ;;  %v699_v1 = vld [vmem:[#allocation2 + $0x20] sm:$0xf] }
 0x252   : > { %v505_v17 = vrot.slane %v504_v8, 1  ;;  %v511_v18 = vrot.slane %v510_v9, 1  ;;  %v527_v19 = vrot.slane %v526_v10, 1  ;;  %v533_v20 = vrot.slane %v532_v11, 1 }
 0x254   : > { %v506_v21 = vadd.f32 %v505_v17, %v504_v8  ;;  %v512_v22 = vadd.f32 %v511_v18, %v510_v9  ;;  %v528_v23 = vadd.f32 %v527_v19, %v526_v10  ;;  %v534_v24 = vadd.f32 %v533_v20, %v532_v11 }
 0x256   : > { %v519_v13 = vadd.f32 %v515_v12, %v506_v21  ;;  %v520_v25 = vadd.f32 %v516_v14, %v512_v22  ;;  %v542_v26 = vadd.f32 %v538_v15, %v528_v23  ;;  %v543_v27 = vadd.f32 %v539_v16, %v534_v24 }
 0x257   : > { %v594_v45 = vld.sshfl [vmem:[#allocation1] sm:$0xff pattern:$0x73625140]  ;;  %v595_v47 = vld.sshfl [vmem:[#allocation1 + $0x8] sm:$0xff pattern:$0x73625140] }
 0x258   : > { %v544_v28 = vmax.f32 %v542_v26, 0.0  ;;  %v545_v29 = vmax.f32 %v543_v27, 0.0  ;;  %v521_v30 = vmax.f32 %v519_v13, 0.0  ;;  %v522_v31 = vmax.f32 %v520_v25, 0.0  ;;  %611 = vst [vmem:[#allocation1] ss:$4 sm:$0xff] %v609_v44 }
 0x25a   : > { %v550_v32 = vrot.slane %v544_v28, 7  ;;  %v551_v33 = vrot.slane %v545_v29, 7 }
 0x25c   : > { %v555_v34 = vsel %vm554_vm13, %v521_v30, %v550_v32  ;;  %v556_v35 = vsel %vm554_vm13, %v522_v31, %v551_v33 }
 0x25d   : > { %569 = vrot.lane.b32.xlu1 %v556_v35, %s988_s19  ;;  %584 = vrot.lane.b32.xlu2 %v555_v34, %s987_s18  ;;  %v566_v2 = vmul.f32 %v562_v37, %v556_v35  ;;  %v565_v3 = vmul.f32 %v561_v36, %v555_v34 }
 0x25e   : > { %567 = vrot.lane.b32.xlu0 %v555_v34, %s988_s19 }
 0x25f   : > { %v612_v48 = vld.sshfl [vmem:[#allocation1] sm:$0xff pattern:$0x73625140]  ;;  %v613_v50 = vld.sshfl [vmem:[#allocation1 + $0x8] sm:$0xff pattern:$0x73625140] }
 0x260   : > { %629 = vst [vmem:[#allocation1] ss:$4 sm:$0xff] %v627_v49 }
 0x265   : > { %602 = vrot.lane.b32.xlu1 %v555_v34, %s990_s22  ;;  %604 = vrot.lane.b32.xlu2 %v556_v35, %s990_s22 }
 0x266   : > { %586 = vrot.lane.b32.xlu0 %v556_v35, %s987_s18 }
 0x267   : > { %v630_v52 = vld.sshfl [vmem:[#allocation1] sm:$0xff pattern:$0x73625140]  ;;  %v631_v53 = vld.sshfl [vmem:[#allocation1 + $0x8] sm:$0xff pattern:$0x73625140] }
 0x268   : > { %647 = vst [vmem:[#allocation1] ss:$4 sm:$0xff] %v645_v51 }
 0x26d   : > { %622 = vrot.lane.b32.xlu1 %v556_v35, %s992_s24  ;;  %638 = vrot.lane.b32.xlu2 %v555_v34, %s993_s26 }
 0x26e   : > { %620 = vrot.lane.b32.xlu0 %v555_v34, %s992_s24 }
 0x26f   : > { %v648_v55 = vld.sshfl [vmem:[#allocation1] sm:$0xff pattern:$0x73625140]  ;;  %v649_v56 = vld.sshfl [vmem:[#allocation1 + $0x8] sm:$0xff pattern:$0x73625140] }
 0x270   : > { %665 = vst [vmem:[#allocation1] ss:$4 sm:$0xff] %v663_v54 }
 0x275   : > { %656 = vrot.lane.b32.xlu1 %v555_v34, %s989_s20  ;;  %658 = vrot.lane.b32.xlu2 %v556_v35, %s989_s20 }
 0x276   : > { %640 = vrot.lane.b32.xlu0 %v556_v35, %s993_s26 }
 0x277   : > { %v666_v58 = vld.sshfl [vmem:[#allocation1] sm:$0xff pattern:$0x73625140]  ;;  %v667_v59 = vld.sshfl [vmem:[#allocation1 + $0x8] sm:$0xff pattern:$0x73625140] }
 0x278   : > { %683 = vst [vmem:[#allocation1] ss:$4 sm:$0xff] %v681_v57 }
 0x27d   : > { %676 = vrot.lane.b32.xlu1 %v556_v35, %s991_s23  ;;  %692 = vrot.lane.b32.xlu2 %v555_v34, %s994_s27 }
 0x27e   : > { %674 = vrot.lane.b32.xlu0 %v555_v34, %s991_s23  ;;  %s268_s23 = scalar_lea.vmem %s1328_s6, %s895_s30 }
 0x27f   : > { %v684_v6 = vld.sshfl [vmem:[#allocation1] sm:$0xff pattern:$0x73625140]  ;;  %v685_v7 = vld.sshfl [vmem:[#allocation1 + $0x8] sm:$0xff pattern:$0x73625140] }
 0x280   : > { %701 = vst [vmem:[#allocation1] ss:$4 sm:$0xff] %v699_v1 }
 0x286   : > { %694 = vrot.lane.b32.xlu0 %v556_v35, %s994_s27 }
 0x287   : > { %v703_v57 = vld.sshfl [vmem:[#allocation1 + $0x8] sm:$0xff pattern:$0x73625140] }
 0x2b7   : > { %v585_v61 = vpop.permute.xlu2 %584 }
 0x2bf   : > { %v605_v15 = vpop.permute.xlu2 %604 }
 0x2c7   : > { %v639_v22 = vpop.permute.xlu2 %638 }
 0x2cf   : > { %v570_v60 = vpop.permute.xlu1 %569  ;;  %v659_v30 = vpop.permute.xlu2 %658 }
 0x2d0   : > { %v568_v62 = vpop.permute.xlu0 %567 }
 0x2d1   : > { %v571_v63 = vsel %vm338_vm5, %v568_v62, %v570_v60  ;;  %v572_v0 = vsel %vm338_vm5, %v570_v60, %v568_v62 }
 0x2d2   : > { %v580_v4 = vmul.f32 %v576_v41, %v572_v0  ;;  %v581_v5 = vmul.f32 %v577_v42, %v571_v63 }
 0x2d4   : > { %v582_v8 = vadd.f32 %v580_v4, %v565_v3  ;;  %v583_v9 = vadd.f32 %v581_v5, %v566_v2 }
 0x2d7   : > { %v603_v10 = vpop.permute.xlu1 %602  ;;  %v693_v60 = vpop.permute.xlu2 %692 }
 0x2d8   : > { %v587_v11 = vpop.permute.xlu0 %586  ;;  %v606_v13 = vsel %vm379_vm7, %v603_v10, %v605_v15  ;;  %v607_v25 = vsel %vm379_vm7, %v605_v15, %v603_v10 }
 0x2d9   : > { %v588_v12 = vsel %vm358_vm6, %v585_v61, %v587_v11  ;;  %v589_v14 = vsel %vm358_vm6, %v587_v11, %v585_v61  ;;  %v616_v31 = vmul.f32 %v612_v48, %v607_v25  ;;  %v617_v32 = vmul.f32 %v613_v50, %v606_v13 }
 0x2da   : > { %v598_v16 = vmul.f32 %v594_v45, %v589_v14  ;;  %v599_v17 = vmul.f32 %v595_v47, %v588_v12 }
 0x2dc   : > { %v600_v18 = vadd.f32 %v598_v16, %v582_v8  ;;  %v601_v19 = vadd.f32 %v599_v17, %v583_v9  ;;  %v726_v17 = vperm.slane %v890_v46, 0 }
 0x2de   : > { %v619_v35 = vadd.f32 %v617_v32, %v601_v19  ;;  %v618_v36 = vadd.f32 %v616_v31, %v600_v18  ;;  %v727_v18 = vperm.slane %v890_v46, 1 }
 0x2df   : > { %v623_v20 = vpop.permute.xlu1 %622 }
 0x2e0   : > { %v621_v21 = vpop.permute.xlu0 %620 }
 0x2e1   : > { %v624_v26 = vsel %vm400_vm8, %v621_v21, %v623_v20  ;;  %v625_v27 = vsel %vm400_vm8, %v623_v20, %v621_v21 }
 0x2e2   : > { %v634_v33 = vmul.f32 %v630_v52, %v625_v27  ;;  %v635_v34 = vmul.f32 %v631_v53, %v624_v26 }
 0x2e4   : > { %v636_v43 = vadd.f32 %v634_v33, %v618_v36  ;;  %v637_v44 = vadd.f32 %v635_v34, %v619_v35 }
 0x2e7   : > { %v657_v23 = vpop.permute.xlu1 %656 }
 0x2e8   : > { %v641_v24 = vpop.permute.xlu0 %640  ;;  %v660_v45 = vsel %vm442_vm10, %v657_v23, %v659_v30  ;;  %v661_v47 = vsel %vm442_vm10, %v659_v30, %v657_v23 }
 0x2e9   : > { %v642_v28 = vsel %vm421_vm9, %v639_v22, %v641_v24  ;;  %v643_v29 = vsel %vm421_vm9, %v641_v24, %v639_v22  ;;  %v670_v52 = vmul.f32 %v666_v58, %v660_v45  ;;  %v671_v53 = vmul.f32 %v667_v59, %v661_v47 }
 0x2ea   : > { %v652_v37 = vmul.f32 %v648_v55, %v642_v28  ;;  %v653_v38 = vmul.f32 %v649_v56, %v643_v29  ;;  %v702_v56 = vld.sshfl [vmem:[#allocation1] sm:$0xff pattern:$0x73625140] }
 0x2ec   : > { %v654_v50 = vadd.f32 %v652_v37, %v636_v43  ;;  %v655_v51 = vadd.f32 %v653_v38, %v637_v44 }
 0x2ee   : > { %v673_v61 = vadd.f32 %v671_v53, %v655_v51  ;;  %v672_v62 = vadd.f32 %v670_v52, %v654_v50 }
 0x2ef   : > { %v677_v41 = vpop.permute.xlu1 %676 }
 0x2f0   : > { %v675_v42 = vpop.permute.xlu0 %674 }
 0x2f1   : > { %v678_v49 = vsel %vm463_vm11, %v675_v42, %v677_v41  ;;  %v679_v48 = vsel %vm463_vm11, %v677_v41, %v675_v42 }
 0x2f2   : > { %v688_v54 = vmul.f32 %v684_v6, %v678_v49  ;;  %v689_v55 = vmul.f32 %v685_v7, %v679_v48 }
 0x2f4   : > { %v690_v2 = vadd.f32 %v688_v54, %v672_v62  ;;  %v691_v3 = vadd.f32 %v689_v55, %v673_v61 }
 0x2f8   : > { %v695_v63 = vpop.permute.xlu0 %694 }
 0x2f9   : > { %v696_v0 = vsel %vm484_vm12, %v693_v60, %v695_v63  ;;  %v697_v1 = vsel %vm484_vm12, %v695_v63, %v693_v60 }
 0x2fa   : > { %v706_v4 = vmul.f32 %v702_v56, %v696_v0  ;;  %v707_v5 = vmul.f32 %v703_v57, %v697_v1 }
 0x2fc   : > { %v708_v58 = vadd.f32 %v706_v4, %v690_v2  ;;  %v709_v59 = vadd.f32 %v707_v5, %v691_v3 }
 0x2fe   : > { %v711_v6 = vsel %vm710_vm14, %v708_v58, 0.0  ;;  %v718_v7 = vsel %vm710_vm14, %v709_v59, 0.0 }
 0x2ff   : > { %v712_v8 = vrot.slane %v711_v6, 4  ;;  %v719_v9 = vrot.slane %v718_v7, 4 }
 0x301   : > { %v713_v10 = vadd.f32 %v712_v8, %v711_v6  ;;  %v720_v11 = vadd.f32 %v719_v9, %v718_v7 }
 0x303   : > { %v714_v12 = vrot.slane %v713_v10, 2  ;;  %v721_v14 = vrot.slane %v720_v11, 2 }
 0x305   : > { %v715_v15 = vadd.f32 %v714_v12, %v713_v10  ;;  %v722_v16 = vadd.f32 %v721_v14, %v720_v11 }
 0x307   : > { %v716_v19 = vrot.slane %v715_v15, 1  ;;  %v723_v20 = vrot.slane %v722_v16, 1 }
 0x309   : > { %v717_v21 = vadd.f32 %v716_v19, %v715_v15  ;;  %v724_v22 = vadd.f32 %v723_v20, %v722_v16 }
 0x30b   : > { %v730_v23 = vadd.f32 %v726_v17, %v717_v21  ;;  %v731_v24 = vadd.f32 %v727_v18, %v724_v22 }
 0x30d   : > { %v891_v13 = vmul.f32 -1.442695, %v730_v23  ;;  %v892_v25 = vmul.f32 -1.442695, %v731_v24 }
 0x30f   : > { %933 = vpow2.f32 %v891_v13 }
 0x310   : > { %935 = vpow2.f32 %v892_v25 }
 0x315   : > { %v934_v26 = vpop.eup %933 }
 0x316   : > { %v936_v27 = vpop.eup %935  ;;  %v738_v28 = vadd.f32 1.0, %v934_v26 }
 0x317   : > { %v739_v29 = vadd.f32 1.0, %v936_v27 }
 0x318   : > { %937 = vrcp.f32 %v738_v28  ;;  %v751_v35 = vand.u32 2147483648, %v738_v28  ;;  %v749_v38 = vand.u32 2147483647, %v738_v28  ;;  %vm745_vm1 = vweird.f32 %v738_v28 }
 0x319   : > { %939 = vrcp.f32 %v739_v29  ;;  %v766_v41 = vand.u32 2147483648, %v739_v29  ;;  %v764_v43 = vand.u32 2147483647, %v739_v29  ;;  %vm760_vm3 = vweird.f32 %v739_v29 }
 0x31a   : > { %v752_v45 = vor.u32 1.1754944e-38, %v751_v35  ;;  %vm750_vm4 = vcmp.eq.f32.partialorder %v749_v38, 8.507059e+37 }
 0x31b   : > { %v767_v48 = vor.u32 1.1754944e-38, %v766_v41  ;;  %vm765_vm6 = vcmp.eq.f32.partialorder %v764_v43, 8.507059e+37 }
 0x31e   : > { %v938_v30 = vpop.eup %937 }
 0x31f   : > { %v940_v31 = vpop.eup %939  ;;  %v741_v32 = vmul.f32 %v938_v30, %v738_v28  ;;  %vm746_vm15 = vweird.f32 %v938_v30 }
 0x320   : > { %v756_v33 = vmul.f32 %v940_v31, %v739_v29  ;;  %vm761_vm0 = vweird.f32 %v940_v31  ;;  %vm747_vm2 = vmor %vm745_vm1, %vm746_vm15 }
 0x321   : > { %v742_v34 = vsub.f32 1.0, %v741_v32  ;;  %vm762_vm5 = vmor %vm760_vm3, %vm761_vm0 }
 0x322   : > { %v757_v36 = vsub.f32 1.0, %v756_v33 }
 0x323   : > { %v743_v37 = vmul.f32 %v938_v30, %v742_v34 }
 0x324   : > { %v758_v42 = vmul.f32 %v940_v31, %v757_v36 }
 0x325   : > { %v744_v44 = vadd.f32 %v938_v30, %v743_v37 }
 0x326   : > { %v759_v47 = vadd.f32 %v940_v31, %v758_v42 }
 0x327   : > { %v748_v49 = vsel %vm747_vm2, %v938_v30, %v744_v44 }
 0x328   : > { %v753_v50 = vsel %vm750_vm4, %v752_v45, %v748_v49  ;;  %v763_v51 = vsel %vm762_vm5, %v940_v31, %v759_v47 }
 0x329   : > { %v768_v52 = vsel %vm765_vm6, %v767_v48, %v763_v51  ;;  %v770_v53 = vperm.slane %v753_v50, 0 }
 0x32a   : > { %v771_v54 = vperm.slane %v768_v52, 0 }
 0x32b   : > { %v772_v55 = vmul.f32 %v770_v53, %v1061_v39 }
 0x32c   : > { %v773_v56 = vmul.f32 %v771_v54, %v1063_v40 }
 0x32d   : > { %774 = vst [vmem:[%s268_s23] sm:$0xff] %v772_v55 }
 0x32e   : > { %775 = vst [vmem:[%s268_s23 + $0x8] sm:$0xff] %v773_v56 }
 0x32f PF: > { %s17_s21 = sadd.s32 1, %s981_s21  }
 0x330   : > { %p14_p7 = scmp.ge.s32.totalorder %s17_s21, 4  }
 0x332   :  { %16 = sbr.rel (!%p14_p7) target bundleno = 1 (0x1), region = 106 }
 0x337   :  { %797 = vsyncpa [#allocation3], 1 }
 0x338   :  { %799 = vsyncpa [#allocation3 + $0x1], 1 }

</bundles_post_ra>
